<compile_context>
chip_gen: v5e
topology: v5e:2x2
jax: 0.10.0
libtpu: 0.0.40
codegen_flags: <defaults>
</compile_context>

<pallas_src>
import jax
import jax.numpy as jnp
from jax.experimental import pallas as pl

LANE = 128          # TPU lane width; all feature dims are zero-padded to this
CONV2_OUT = 4       # fixed by the module: GCNConv(hidden, 4)


def gcn1_kernel(x_ref, pm_ref, w_ref, b_ref, out_ref):
    # Whole-array blocks, single invocation:
    #   x   (BN, 128)      bf16  stacked, zero-padded node features
    #   pm  (BN, BN)       bf16  block-diagonal mean-aggregation matrix
    #   w   (3, 128, 128)  bf16  packed weights (w1, w2, wc), zero-padded
    #   b   (3, 128)       f32   packed biases
    #   out (BN, 128)      f32
    x = x_ref[...]
    pm = pm_ref[...]

    # conv1: aggregate-then-transform  ->  (P @ X) @ W1 + b1, ReLU
    ax = jnp.dot(pm, x, preferred_element_type=jnp.float32)
    h = jnp.dot(ax.astype(jnp.bfloat16), w_ref[0],
                preferred_element_type=jnp.float32)
    h = jnp.maximum(h + b_ref[0:1, :], 0.0)

    # conv2: transform-then-aggregate  ->  P @ (H @ W2) + b2, ReLU
    h = jnp.dot(h.astype(jnp.bfloat16), w_ref[1],
                preferred_element_type=jnp.float32)
    h = jnp.dot(pm, h.astype(jnp.bfloat16),
                preferred_element_type=jnp.float32)
    h = jnp.maximum(h + b_ref[1:2, :], 0.0)

    # classifier: Linear(4 -> C) as one MXU matmul; padded lanes of h and the
    # padded rows of wc are zero, so extra columns contribute nothing.
    logits = jnp.dot(h.astype(jnp.bfloat16), w_ref[2],
                     preferred_element_type=jnp.float32)
    out_ref[...] = logits + b_ref[2:3, :]   # lane-dense (BN, 128) unmasked store


def gcn1_forward(x, p_mean, params):
    """x: (B, N, F) node features; p_mean: (B, N, N) propagation matrices."""
    B, N, F = x.shape
    H = params["w1"].shape[1]
    C = params["wc"].shape[1]
    BN = B * N

    # Stack the batch: features -> (BN, 128), P -> block-diagonal (BN, BN).
    x_p = jnp.zeros((BN, LANE), jnp.bfloat16)
    x_p = x_p.at[:, :F].set(x.reshape(BN, F).astype(jnp.bfloat16))

    eye_b = jnp.eye(B, dtype=p_mean.dtype)
    p_blk = (eye_b[:, None, :, None] * p_mean[:, :, None, :]).reshape(BN, BN)
    p_blk = p_blk.astype(jnp.bfloat16)

    # Pack weights / biases into lane-dense, zero-padded slabs.
    w_slab = jnp.zeros((3, LANE, LANE), jnp.float32)
    w_slab = w_slab.at[0, :F, :H].set(params["w1"])
    w_slab = w_slab.at[1, :H, :CONV2_OUT].set(params["w2"])
    w_slab = w_slab.at[2, :CONV2_OUT, :C].set(params["wc"])
    w_slab = w_slab.astype(jnp.bfloat16)

    b_slab = jnp.zeros((3, LANE), jnp.float32)
    b_slab = b_slab.at[0, :H].set(params["b1"])
    b_slab = b_slab.at[1, :CONV2_OUT].set(params["b2"])
    b_slab = b_slab.at[2, :C].set(params["bc"])

    # Single grid step: whole arrays resident in VMEM (~50 KiB total).
    out = pl.pallas_call(
        gcn1_kernel,
        out_shape=jax.ShapeDtypeStruct((BN, LANE), jnp.float32),
    )(x_p, p_blk, w_slab, b_slab)

    return out.reshape(B, N, LANE)[:, :, :C]


def build_mean_propagation(edge_index, num_nodes):
    """Dense GCN mean-aggregation propagation matrix from a PyG edge_index.

    Mirrors gcn_norm (scatter-add degrees, add self loops) followed by the
    'mean' aggregation's divide-by-#messages.  Edge lists passed here are
    deduplicated and self-loop-free (built that way in the driver).
    """
    src, dst = edge_index[0], edge_index[1]
    a = jnp.zeros((num_nodes, num_nodes), jnp.float32)
    a = a.at[dst, src].add(1.0)                       # A[i, j] for edge j -> i
    diag = jnp.arange(num_nodes)
    a = a.at[diag, diag].add(1.0)                     # self loops
    deg = jnp.sum(a, axis=1)                          # in-degree incl. self loop
    dinv_sqrt = jnp.where(deg > 0, 1.0 / jnp.sqrt(deg), 0.0)
    n_hat = a * dinv_sqrt[:, None] * dinv_sqrt[None, :]
    p_mean = n_hat / jnp.maximum(deg, 1.0)[:, None]   # mean over #messages
    return p_mean


def make_graph(n, stride):
    """Deterministic undirected ring + chords, no self loops, no duplicates."""
    edges = set()
    for i in range(n):
        j = (i + 1) % n
        edges.add((i, j)); edges.add((j, i))
        k = (i + stride) % n
        if k != i:
            edges.add((i, k)); edges.add((k, i))
    edges = sorted(edges)
    src = [e[0] for e in edges]
    dst = [e[1] for e in edges]
    return jnp.array([src, dst], dtype=jnp.int32)


def glorot(key, shape):
    fan_in, fan_out = shape
    lim = jnp.sqrt(6.0 / (fan_in + fan_out))
    return jax.random.uniform(key, shape, jnp.float32, -lim, lim)


def reference(x, p_mean, params):
    """Pure-JAX f32 reference of the module forward (for correctness check)."""
    h = jnp.einsum("bij,bjf->bif", p_mean, jnp.einsum("bnf,fh->bnh", x, params["w1"]))
    h = jnp.maximum(h + params["b1"], 0.0)
    h = jnp.einsum("bij,bjf->bif", p_mean, jnp.einsum("bnf,fh->bnh", h, params["w2"]))
    h = jnp.maximum(h + params["b2"], 0.0)
    return jnp.einsum("bnf,fc->bnc", h, params["wc"]) + params["bc"]


if __name__ == "__main__":
    key = jax.random.PRNGKey(0)
    B, N, F_IN, HIDDEN, NUM_CLASSES = 4, 16, 8, 16, 6   # hidden_channel=16 (module default)

    k_x, k1, k2, kc, kbc = jax.random.split(key, 5)

    # Batch of B deterministic graphs (different chord strides).
    strides = (2, 3, 5, 7)
    p_mean = jnp.stack(
        [build_mean_propagation(make_graph(N, s), N) for s in strides[:B]])

    x = jax.random.normal(k_x, (B, N, F_IN), jnp.float32)

    params = {
        "w1": glorot(k1, (F_IN, HIDDEN)),
        "b1": jnp.zeros((HIDDEN,), jnp.float32),        # GCNConv bias init = zeros
        "w2": glorot(k2, (HIDDEN, CONV2_OUT)),
        "b2": jnp.zeros((CONV2_OUT,), jnp.float32),
        "wc": glorot(kc, (CONV2_OUT, NUM_CLASSES)),
        "bc": jax.random.uniform(kbc, (NUM_CLASSES,), jnp.float32, -0.5, 0.5),
    }

    out = gcn1_forward(x, p_mean, params)
    jax.block_until_ready(out)
    assert out.shape == (B, N, NUM_CLASSES)

    ref = reference(x, p_mean, params)
    # bf16 MXU operands with f32 accumulation -> slightly looser tolerance.
    assert jnp.allclose(out, ref, rtol=2e-2, atol=2e-2), float(jnp.max(jnp.abs(out - ref)))

    print("KERNEL_OK")
</pallas_src>

<mosaic_0001>
module attributes {stable_mosaic.version = 11 : i64} {
  func.func @gcn1_kernel(%arg0: memref<64x128xbf16, #tpu.memory_space<vmem>>, %arg1: memref<64x64xbf16, #tpu.memory_space<vmem>>, %arg2: memref<3x128x128xbf16, #tpu.memory_space<vmem>>, %arg3: memref<3x128xf32, #tpu.memory_space<vmem>>, %arg4: memref<64x128xf32, #tpu.memory_space<vmem>>) attributes {dimension_semantics = [], scalar_prefetch = 0 : i64, scratch_operands = 0 : i64, tpu.core_type = #tpu.core_type<tc>} {
    %c0 = arith.constant 0 : index
    %c0_0 = arith.constant 0 : index
    %0 = vector.load %arg0[%c0, %c0_0] : memref<64x128xbf16, #tpu.memory_space<vmem>>, vector<64x128xbf16>
    %c0_1 = arith.constant 0 : index
    %c0_2 = arith.constant 0 : index
    %1 = vector.load %arg1[%c0_1, %c0_2] : memref<64x64xbf16, #tpu.memory_space<vmem>>, vector<64x64xbf16>
    %cst = arith.constant dense<0.000000e+00> : vector<64x128xf32>
    %2 = tpu.matmul %1, %0, %cst {dimension_numbers = #tpu.dot_dimension_numbers<[1], [0], [0], [1], [0, 0, 1, 1], [], []>} : vector<64x64xbf16>, vector<64x128xbf16>, vector<64x128xf32> -> vector<64x128xf32>
    %3 = arith.truncf %2 : vector<64x128xf32> to vector<64x128xbf16>
    %c0_3 = arith.constant 0 : index
    %c0_4 = arith.constant 0 : index
    %c0_5 = arith.constant 0 : index
    %4 = vector.load %arg2[%c0_3, %c0_4, %c0_5] : memref<3x128x128xbf16, #tpu.memory_space<vmem>>, vector<1x128x128xbf16>
    %5 = vector.shape_cast %4 : vector<1x128x128xbf16> to vector<128x128xbf16>
    %cst_6 = arith.constant dense<0.000000e+00> : vector<64x128xf32>
    %6 = tpu.matmul %3, %5, %cst_6 {dimension_numbers = #tpu.dot_dimension_numbers<[1], [0], [0], [1], [0, 0, 1, 1], [], []>} : vector<64x128xbf16>, vector<128x128xbf16>, vector<64x128xf32> -> vector<64x128xf32>
    %c0_7 = arith.constant 0 : index
    %c0_8 = arith.constant 0 : index
    %7 = vector.load %arg3[%c0_7, %c0_8] : memref<3x128xf32, #tpu.memory_space<vmem>>, vector<1x128xf32>
    %8 = vector.broadcast %7 : vector<1x128xf32> to vector<64x128xf32>
    %9 = arith.addf %6, %8 : vector<64x128xf32>
    %cst_9 = arith.constant 0.000000e+00 : f32
    %10 = vector.broadcast %cst_9 : f32 to vector<64x128xf32>
    %11 = arith.maximumf %9, %10 : vector<64x128xf32>
    %12 = arith.truncf %11 : vector<64x128xf32> to vector<64x128xbf16>
    %c1 = arith.constant 1 : index
    %c0_10 = arith.constant 0 : index
    %c0_11 = arith.constant 0 : index
    %13 = vector.load %arg2[%c1, %c0_10, %c0_11] : memref<3x128x128xbf16, #tpu.memory_space<vmem>>, vector<1x128x128xbf16>
    %14 = vector.shape_cast %13 : vector<1x128x128xbf16> to vector<128x128xbf16>
    %cst_12 = arith.constant dense<0.000000e+00> : vector<64x128xf32>
    %15 = tpu.matmul %12, %14, %cst_12 {dimension_numbers = #tpu.dot_dimension_numbers<[1], [0], [0], [1], [0, 0, 1, 1], [], []>} : vector<64x128xbf16>, vector<128x128xbf16>, vector<64x128xf32> -> vector<64x128xf32>
    %16 = arith.truncf %15 : vector<64x128xf32> to vector<64x128xbf16>
    %cst_13 = arith.constant dense<0.000000e+00> : vector<64x128xf32>
    %17 = tpu.matmul %1, %16, %cst_13 {dimension_numbers = #tpu.dot_dimension_numbers<[1], [0], [0], [1], [0, 0, 1, 1], [], []>} : vector<64x64xbf16>, vector<64x128xbf16>, vector<64x128xf32> -> vector<64x128xf32>
    %c1_14 = arith.constant 1 : index
    %c0_15 = arith.constant 0 : index
    %18 = vector.load %arg3[%c1_14, %c0_15] : memref<3x128xf32, #tpu.memory_space<vmem>>, vector<1x128xf32>
    %19 = vector.broadcast %18 : vector<1x128xf32> to vector<64x128xf32>
    %20 = arith.addf %17, %19 : vector<64x128xf32>
    %cst_16 = arith.constant 0.000000e+00 : f32
    %21 = vector.broadcast %cst_16 : f32 to vector<64x128xf32>
    %22 = arith.maximumf %20, %21 : vector<64x128xf32>
    %23 = arith.truncf %22 : vector<64x128xf32> to vector<64x128xbf16>
    %c2 = arith.constant 2 : index
    %c0_17 = arith.constant 0 : index
    %c0_18 = arith.constant 0 : index
    %24 = vector.load %arg2[%c2, %c0_17, %c0_18] : memref<3x128x128xbf16, #tpu.memory_space<vmem>>, vector<1x128x128xbf16>
    %25 = vector.shape_cast %24 : vector<1x128x128xbf16> to vector<128x128xbf16>
    %cst_19 = arith.constant dense<0.000000e+00> : vector<64x128xf32>
    %26 = tpu.matmul %23, %25, %cst_19 {dimension_numbers = #tpu.dot_dimension_numbers<[1], [0], [0], [1], [0, 0, 1, 1], [], []>} : vector<64x128xbf16>, vector<128x128xbf16>, vector<64x128xf32> -> vector<64x128xf32>
    %c2_20 = arith.constant 2 : index
    %c0_21 = arith.constant 0 : index
    %27 = vector.load %arg3[%c2_20, %c0_21] : memref<3x128xf32, #tpu.memory_space<vmem>>, vector<1x128xf32>
    %28 = vector.broadcast %27 : vector<1x128xf32> to vector<64x128xf32>
    %29 = arith.addf %26, %28 : vector<64x128xf32>
    %c0_22 = arith.constant 0 : index
    %c0_23 = arith.constant 0 : index
    %30 = vector.load %arg4[%c0_22, %c0_23] : memref<64x128xf32, #tpu.memory_space<vmem>>, vector<64x128xf32>
    tpu.vector_store %arg4[%c0_22, %c0_23], %29 {strides = array<i32>} : memref<64x128xf32, #tpu.memory_space<vmem>>, vector<64x128xf32>,
    return
  }
}

</mosaic_0001>

<bundles_post_ra>
// kernel: tpu_custom_call.1
= control target key start
LH: loop header
LB: loop body
LE: loop exit
PB: predicated region body
PF: predicated region fallthrough
CT: control target
= control target key end

     0   :  { %9 = vsyncpa [#allocation3], 0  ;;  %s944_s0 = inlined_call_operand.hbm [shape: bf16[64,128], index: 0, kind: input, shape index: {}]   ;;  %s945_s1 = inlined_call_operand.hbm [shape: bf16[64,64], index: 1, kind: input, shape index: {}]   ;;  %s946_s2 = inlined_call_operand.hbm [shape: bf16[3,128,128], index: 2, kind: input, shape index: {}]   ;;  %s947_s3 = inlined_call_operand.hbm [shape: f32[3,128], index: 3, kind: input, shape index: {}]   ;;  %s948_s4 = inlined_call_operand.hbm [shape: f32[64,128], index: 4, kind: output, shape index: {}]  }
   0x1   :  { %10 = vsyncpa [#allocation6], 0 }
   0x2   :  { %11 = vsyncpa [#allocation9], 0 }
   0x3   :  { %12 = vsyncpa [#allocation4], 0  ;;  %s30_s17 = sshll.u32 %s945_s1, 4  ;;  %s871_s18 = smov [#allocation5]   ;;  %s31_s17 = int_to_ptr.hbm [resolvable:$true] %s30_s17 }
   0x4   :  { %s32_s19 = sshll.u32 %s871_s18, 4  ;;  %s17_s22 = sshll.u32 %s944_s0, 4  ;;  %s33_s19 = int_to_ptr.vmem [resolvable:$true] %s32_s19  ;;  %s18_s22 = int_to_ptr.hbm [resolvable:$true] %s17_s22 }
   0x5   :  { %s872_s23 = smov 64   ;;  %s873_s24 = smov 4  }
   0x6   :  { %38 = dma.hbm_to_vmem [thread:$0]  %s31_s17, 512, %s33_s19, [#allocation6], %s872_s23, %s872_s23, %s873_s24  }
   0x7   :  { %s874_s25 = smov [#allocation2]   ;;  %s43_s29 = sshll.u32 %s946_s2, 4  ;;  %s44_s29 = int_to_ptr.hbm [resolvable:$true] %s43_s29 }
   0x8   :  { %s19_s26 = sshll.u32 %s874_s25, 4  ;;  %s57_s5 = sshll.u32 %s947_s3, 4  ;;  %s20_s26 = int_to_ptr.vmem [resolvable:$true] %s19_s26  ;;  %s58_s5 = int_to_ptr.hbm [resolvable:$true] %s57_s5 }
   0x9   :  { %25 = dma.hbm_to_vmem [thread:$0]  %s18_s22, 512, %s20_s26, [#allocation3], %s872_s23, %s872_s23, %s873_s24  }
   0xa   :  { %s875_s6 = smov [#allocation7]   ;;  %s876_s0 = smov [#allocation8]  }
   0xb   :  { %s45_s7 = sshll.u32 %s875_s6, 4  ;;  %s59_s8 = sshll.u32 %s876_s0, 4  ;;  %s46_s7 = int_to_ptr.vmem [resolvable:$true] %s45_s7  ;;  %s60_s8 = int_to_ptr.vmem [resolvable:$true] %s59_s8 }
   0xc   :  { %51 = dma.hbm_to_vmem [thread:$0]  %s44_s29, 3072, %s46_s7, [#allocation6], %s872_s23, %s872_s23, %s873_s24  }
   0xd   :  { %62 = dma.hbm_to_vmem [thread:$0]  %s58_s5, 64, %s60_s8, [#allocation9]  }
   0xe   :  { %863 = dma.done.wait [#allocation3], 512  }
   0xf   :  { %864 = vsyncadd [#allocation3], 4294966784 }
  0x10   :  { %865 = dma.done.wait [#allocation6], 3584  }
  0x11   :  { %866 = vsyncadd [#allocation6], 4294963712 }
  0x12   :  { %867 = dma.done.wait [#allocation9], 64  }
  0x13   :  { %868 = vsyncadd [#allocation9], 4294967232  ;;  %v698_v0 = vld [vmem:[#allocation2 + $0x18] sm:$0xff]  ;;  %v697_v1 = vld [vmem:[#allocation2 + $0x10] sm:$0xff]  ;;  %vm140_vm0 = vcmask 523264   ;;  %s877_s2 = smov [#allocation10]  }
  0x14   :  { %157 = vmatpush.bf16.msra.mxu0 %v698_v0  ;;  %727 = vmatpush.bf16.msra.mxu3 %v698_v0  ;;  %v710_v2 = vld [vmem:[#allocation7 + $0x38] sm:$0xff]  ;;  %v709_v3 = vld [vmem:[#allocation7 + $0x30] sm:$0xff]  ;;  %v696_v4 = vld [vmem:[#allocation2 + $0x8] sm:$0xff]  ;;  %s542_s3 = sshll.u32 %s877_s2, 4  ;;  %s544_s11 = sshll.u32 %s948_s4, 4  ;;  %s543_s3 = int_to_ptr.vmem [resolvable:$true] %s542_s3  ;;  %s545_s11 = int_to_ptr.hbm [resolvable:$true] %s544_s11 }
  0x15   :  { %252 = vmatpush.bf16.msra.mxu1 %v710_v2  ;;  %v708_v5 = vld [vmem:[#allocation7 + $0x28] sm:$0xff]  ;;  %v695_v6 = vld [vmem:[#allocation2] sm:$0xff]  ;;  %v919_v9 = vld [vmem:[#allocation5 + $0x10] sm:$0xff]  ;;  %s878_s12 = smov 128   ;;  %s879_s13 = smov 8  }
  0x16   :  { %v707_v7 = vld [vmem:[#allocation7 + $0x20] sm:$0xff]  ;;  %v706_v10 = vld [vmem:[#allocation7 + $0x18] sm:$0xff]  ;;  %v925_v11 = vld [vmem:[#allocation5 + $0x8] sm:$0xff] }
  0x17   :  { %v917_v8 = vld [vmem:[#allocation5] sm:$0xff]  ;;  %v927_v12 = vld [vmem:[#allocation5 + $0x18] sm:$0xff]  ;;  %v705_v13 = vld [vmem:[#allocation7 + $0x10] sm:$0xff] }
  0x18   :  { %158 = vmatpush.bf16.msra.mxu0 %v697_v1  ;;  %728 = vmatpush.bf16.msra.mxu3 %v697_v1  ;;  %v704_v14 = vld [vmem:[#allocation7 + $0x8] sm:$0xff]  ;;  %v703_v15 = vld [vmem:[#allocation7] sm:$0xff]  ;;  %v718_v23 = vld [vmem:[#allocation7 + $0x78] sm:$0xff] }
  0x19   :  { %253 = vmatpush.bf16.msra.mxu1 %v709_v3  ;;  %358 = vmatpush.bf16.msra.mxu2 %v718_v23  ;;  %v717_v24 = vld [vmem:[#allocation7 + $0x70] sm:$0xff]  ;;  %v716_v25 = vld [vmem:[#allocation7 + $0x68] sm:$0xff]  ;;  %v715_v27 = vld [vmem:[#allocation7 + $0x60] sm:$0xff] }
  0x1a   :  { %v714_v32 = vld [vmem:[#allocation7 + $0x58] sm:$0xff]  ;;  %v713_v33 = vld [vmem:[#allocation7 + $0x50] sm:$0xff]  ;;  %v712_v34 = vld [vmem:[#allocation7 + $0x48] sm:$0xff] }
  0x1b   :  { %v711_v35 = vld [vmem:[#allocation7 + $0x40] sm:$0xff] }
  0x1c   :  { %159 = vmatpush.bf16.msra.mxu0 %v696_v4  ;;  %729 = vmatpush.bf16.msra.mxu3 %v696_v4  ;;  %v740_v37 = vld [vmem:[#allocation8] ss:$0 sm:$0xff] }
  0x1d   :  { %254 = vmatpush.bf16.msra.mxu1 %v708_v5  ;;  %359 = vmatpush.bf16.msra.mxu2 %v717_v24  ;;  %v741_v24 = vld [vmem:[#allocation8 + $0x1] ss:$0 sm:$0xff] }
  0x20   :  { %160 = vmatpush.bf16.msra.mxu0 %v695_v6  ;;  %730 = vmatpush.bf16.msra.mxu3 %v695_v6 }
  0x21   :  { %255 = vmatpush.bf16.msra.mxu1 %v707_v7  ;;  %360 = vmatpush.bf16.msra.mxu2 %v716_v25 }
  0x23   :  { %591 = vmatmul.msk.bf16.vlgmr.msra.gmra.mxu0 %vm140_vm0, %v917_v8  ;;  %593 = vmatmul.msk.bf16.vlgmr.msra.gmra.mxu3 %vm140_vm0, %v919_v9 }
  0x25   :  { %256 = vmatpush.bf16.msra.mxu1 %v706_v10  ;;  %361 = vmatpush.bf16.msra.mxu2 %v715_v27 }
  0x29   :  { %257 = vmatpush.bf16.msra.mxu1 %v705_v13  ;;  %362 = vmatpush.bf16.msra.mxu2 %v714_v32 }
  0x2d   :  { %258 = vmatpush.bf16.msra.mxu1 %v704_v14  ;;  %363 = vmatpush.bf16.msra.mxu2 %v713_v33 }
  0x31   :  { %259 = vmatpush.bf16.msra.mxu1 %v703_v15  ;;  %364 = vmatpush.bf16.msra.mxu2 %v712_v34 }
  0x33   :  { %592 = vmatmul.msk.bf16.gmra.mxu0 %vm140_vm0, %v925_v11  ;;  %594 = vmatmul.msk.bf16.gmra.mxu3 %vm140_vm0, %v927_v12 }
  0x35   :  { %365 = vmatpush.bf16.msra.mxu2 %v711_v35 }
  0xa0   :  { %v162_v16 = vpop.f32.mrf.mxu0 }
  0xa6   :  { %v172_v21 = vpop.f32.mrf.mxu3 }
  0xa8   :  { %v164_v17 = vpop.f32.mrf.mxu0 }
  0xa9   :  { %v182_v18 = vpack.c.bf16 %v164_v17, %v162_v16  ;;  %v726_v17 = vld [vmem:[#allocation7 + $0xb8] sm:$0xff] }
  0xaa   :  { %501 = vmatpush.bf16.msrb.mxu0 %v726_v17 }
  0xab   :  { %260 = vmatmul.bf16.vlgmr.msra.gmra.mxu1 %v182_v18  ;;  %v725_v18 = vld [vmem:[#allocation7 + $0xb0] sm:$0xff] }
  0xae   :  { %v174_v26 = vpop.f32.mrf.mxu3  ;;  %502 = vmatpush.bf16.msrb.mxu0 %v725_v18 }
  0xaf   :  { %v184_v28 = vpack.c.bf16 %v174_v26, %v172_v21  ;;  %v722_v21 = vld [vmem:[#allocation7 + $0x98] sm:$0xff] }
  0xb0   :  { %v167_v19 = vpop.f32.mrf.mxu0 }
  0xb6   :  { %v177_v29 = vpop.f32.mrf.mxu3 }
  0xb8   :  { %v169_v20 = vpop.f32.mrf.mxu0 }
  0xb9   :  { %v183_v22 = vpack.c.bf16 %v169_v20, %v167_v19  ;;  %v724_v19 = vld [vmem:[#allocation7 + $0xa8] sm:$0xff]  ;;  %v723_v20 = vld [vmem:[#allocation7 + $0xa0] sm:$0xff] }
  0xba   :  { %503 = vmatpush.bf16.msrb.mxu0 %v724_v19 }
  0xbb   :  { %265 = vmatmul.bf16.gmra.mxu1 %v183_v22  ;;  %v720_v22 = vld [vmem:[#allocation7 + $0x88] sm:$0xff] }
  0xbe   :  { %v179_v30 = vpop.f32.mrf.mxu3  ;;  %504 = vmatpush.bf16.msrb.mxu0 %v723_v20 }
  0xbf   :  { %v185_v31 = vpack.c.bf16 %v179_v30, %v177_v29 }
  0xc2   :  { %505 = vmatpush.bf16.msrb.mxu0 %v722_v21 }
  0xcb   :  { %270 = vmatmul.bf16.gmra.mxu1 %v184_v28 }
  0xdb   :  { %275 = vmatmul.bf16.gmra.mxu1 %v185_v31 }
 0x128   :  { %v261_v36 = vpop.f32.mrf.mxu1 }
 0x129   :  { %v262_v38 = vadd.f32 %v740_v37, %v261_v36 }
 0x12b   :  { %v281_v41 = vmax.f32 %v262_v38, 0.0 }
 0x130   :  { %v263_v39 = vpop.f32.mrf.mxu1 }
 0x131   :  { %v264_v40 = vadd.f32 %v740_v37, %v263_v39 }
 0x133   :  { %v282_v42 = vmax.f32 %v264_v40, 0.0 }
 0x135   :  { %v289_v43 = vpack.c.bf16 %v282_v42, %v281_v41 }
 0x137   :  { %366 = vmatmul.bf16.vlgmr.msra.gmra.mxu2 %v289_v43 }
 0x138   :  { %v266_v44 = vpop.f32.mrf.mxu1 }
 0x139   :  { %v267_v45 = vadd.f32 %v740_v37, %v266_v44 }
 0x13b   :  { %v283_v48 = vmax.f32 %v267_v45, 0.0 }
 0x140   :  { %v268_v46 = vpop.f32.mrf.mxu1 }
 0x141   :  { %v269_v47 = vadd.f32 %v740_v37, %v268_v46 }
 0x143   :  { %v284_v49 = vmax.f32 %v269_v47, 0.0 }
 0x145   :  { %v290_v50 = vpack.c.bf16 %v284_v49, %v283_v48 }
 0x147   :  { %371 = vmatmul.bf16.gmra.mxu2 %v290_v50  ;;  %v742_v50 = vld [vmem:[#allocation8 + $0x2] ss:$0 sm:$0xff] }
 0x148   :  { %v271_v51 = vpop.f32.mrf.mxu1 }
 0x149   :  { %v272_v52 = vadd.f32 %v740_v37, %v271_v51 }
 0x14b   :  { %v285_v55 = vmax.f32 %v272_v52, 0.0 }
 0x150   :  { %v273_v53 = vpop.f32.mrf.mxu1 }
 0x151   :  { %v274_v54 = vadd.f32 %v740_v37, %v273_v53 }
 0x153   :  { %v286_v56 = vmax.f32 %v274_v54, 0.0 }
 0x155   :  { %v291_v57 = vpack.c.bf16 %v286_v56, %v285_v55 }
 0x157   :  { %376 = vmatmul.bf16.gmra.mxu2 %v291_v57 }
 0x158   :  { %v276_v58 = vpop.f32.mrf.mxu1 }
 0x159   :  { %v277_v59 = vadd.f32 %v740_v37, %v276_v58 }
 0x15b   :  { %v287_v62 = vmax.f32 %v277_v59, 0.0 }
 0x160   :  { %v278_v60 = vpop.f32.mrf.mxu1 }
 0x161   :  { %v279_v61 = vadd.f32 %v740_v37, %v278_v60 }
 0x163   :  { %v288_v63 = vmax.f32 %v279_v61, 0.0 }
 0x165   :  { %v292_v0 = vpack.c.bf16 %v288_v63, %v287_v62 }
 0x167   :  { %381 = vmatmul.bf16.gmra.mxu2 %v292_v0 }
 0x1ba   :  { %v367_v1 = vpop.f32.mrf.mxu2 }
 0x1c2   :  { %v369_v2 = vpop.f32.mrf.mxu2 }
 0x1c3   :  { %v387_v16 = vpack.c.bf16 %v369_v2, %v367_v1 }
 0x1ca   :  { %v372_v3 = vpop.f32.mrf.mxu2 }
 0x1d2   :  { %v374_v4 = vpop.f32.mrf.mxu2 }
 0x1d3   :  { %v388_v15 = vpack.c.bf16 %v374_v4, %v372_v3 }
 0x1da   :  { %v377_v5 = vpop.f32.mrf.mxu2 }
 0x1e2   :  { %v379_v6 = vpop.f32.mrf.mxu2 }
 0x1e3   :  { %v389_v14 = vpack.c.bf16 %v379_v6, %v377_v5 }
 0x1ea   :  { %v382_v7 = vpop.f32.mrf.mxu2 }
 0x1f2   :  { %v384_v10 = vpop.f32.mrf.mxu2 }
 0x1f3   :  { %v390_v13 = vpack.c.bf16 %v384_v10, %v382_v7 }
 0x1f5   :  { %397 = vmatpush.bf16.msrb.mxu3 %v390_v13 }
 0x1f9   :  { %398 = vmatpush.bf16.msrb.mxu3 %v389_v14 }
 0x1fd   :  { %399 = vmatpush.bf16.msrb.mxu3 %v388_v15 }
 0x201   :  { %400 = vmatpush.bf16.msrb.mxu3 %v387_v16 }
 0x204   :  { %659 = vmatmul.msk.bf16.vlgmr.msrb.gmra.mxu3 %vm140_vm0, %v917_v8  ;;  %v721_v8 = vld [vmem:[#allocation7 + $0x90] sm:$0xff] }
 0x205   :  { %506 = vmatpush.bf16.msrb.mxu0 %v721_v8 }
 0x209   :  { %507 = vmatpush.bf16.msrb.mxu0 %v720_v22 }
 0x214   :  { %660 = vmatmul.msk.bf16.gmra.mxu3 %vm140_vm0, %v925_v11  ;;  %v719_v11 = vld [vmem:[#allocation7 + $0x80] sm:$0xff] }
 0x215   :  { %508 = vmatpush.bf16.msrb.mxu0 %v719_v11 }
 0x224   :  { %661 = vmatmul.msk.bf16.gmra.mxu3 %vm140_vm0, %v919_v9 }
 0x234   :  { %662 = vmatmul.msk.bf16.gmra.mxu3 %vm140_vm0, %v927_v12 }
 0x287   :  { %v402_v23 = vpop.f32.mrf.mxu3 }
 0x288   :  { %v403_v25 = vadd.f32 %v741_v24, %v402_v23 }
 0x28a   :  { %v422_v28 = vmax.f32 %v403_v25, 0.0 }
 0x28f   :  { %v404_v26 = vpop.f32.mrf.mxu3 }
 0x290   :  { %v405_v27 = vadd.f32 %v741_v24, %v404_v26 }
 0x292   :  { %v423_v29 = vmax.f32 %v405_v27, 0.0 }
 0x294   :  { %v430_v30 = vpack.c.bf16 %v423_v29, %v422_v28 }
 0x296   :  { %509 = vmatmul.bf16.vlgmr.msrb.gmra.mxu0 %v430_v30 }
 0x297   :  { %v407_v9 = vpop.f32.mrf.mxu3 }
 0x298   :  { %v408_v31 = vadd.f32 %v741_v24, %v407_v9 }
 0x29a   :  { %v424_v33 = vmax.f32 %v408_v31, 0.0 }
 0x29f   :  { %v409_v12 = vpop.f32.mrf.mxu3 }
 0x2a0   :  { %v410_v32 = vadd.f32 %v741_v24, %v409_v12 }
 0x2a2   :  { %v425_v34 = vmax.f32 %v410_v32, 0.0 }
 0x2a4   :  { %v431_v35 = vpack.c.bf16 %v425_v34, %v424_v33 }
 0x2a6   :  { %514 = vmatmul.bf16.gmra.mxu0 %v431_v35 }
 0x2a7   :  { %v412_v36 = vpop.f32.mrf.mxu3 }
 0x2a8   :  { %v413_v37 = vadd.f32 %v741_v24, %v412_v36 }
 0x2aa   :  { %v426_v40 = vmax.f32 %v413_v37, 0.0 }
 0x2af   :  { %v414_v38 = vpop.f32.mrf.mxu3 }
 0x2b0   :  { %v415_v39 = vadd.f32 %v741_v24, %v414_v38 }
 0x2b2   :  { %v427_v41 = vmax.f32 %v415_v39, 0.0 }
 0x2b4   :  { %v432_v42 = vpack.c.bf16 %v427_v41, %v426_v40 }
 0x2b6   :  { %519 = vmatmul.bf16.gmra.mxu0 %v432_v42 }
 0x2b7   :  { %v417_v43 = vpop.f32.mrf.mxu3 }
 0x2b8   :  { %v418_v44 = vadd.f32 %v741_v24, %v417_v43 }
 0x2ba   :  { %v428_v47 = vmax.f32 %v418_v44, 0.0 }
 0x2bf   :  { %v419_v45 = vpop.f32.mrf.mxu3 }
 0x2c0   :  { %v420_v46 = vadd.f32 %v741_v24, %v419_v45 }
 0x2c2   :  { %v429_v48 = vmax.f32 %v420_v46, 0.0 }
 0x2c4   :  { %v433_v49 = vpack.c.bf16 %v429_v48, %v428_v47 }
 0x2c6   :  { %524 = vmatmul.bf16.gmra.mxu0 %v433_v49 }
 0x313   :  { %v510_v51 = vpop.f32.mrf.mxu0 }
 0x314   :  { %v511_v52 = vadd.f32 %v742_v50, %v510_v51 }
 0x316   :  { %530 = vst [vmem:[#allocation10] sm:$0xff] %v511_v52 }
 0x31b   :  { %v512_v53 = vpop.f32.mrf.mxu0 }
 0x31c   :  { %v513_v54 = vadd.f32 %v742_v50, %v512_v53 }
 0x31e   :  { %531 = vst [vmem:[#allocation10 + $0x8] sm:$0xff] %v513_v54 }
 0x323   :  { %v515_v55 = vpop.f32.mrf.mxu0 }
 0x324   :  { %v516_v56 = vadd.f32 %v742_v50, %v515_v55 }
 0x326   :  { %532 = vst [vmem:[#allocation10 + $0x10] sm:$0xff] %v516_v56 }
 0x32b   :  { %v517_v57 = vpop.f32.mrf.mxu0 }
 0x32c   :  { %v518_v58 = vadd.f32 %v742_v50, %v517_v57 }
 0x32e   :  { %533 = vst [vmem:[#allocation10 + $0x18] sm:$0xff] %v518_v58 }
 0x333   :  { %v520_v59 = vpop.f32.mrf.mxu0 }
 0x334   :  { %v521_v60 = vadd.f32 %v742_v50, %v520_v59 }
 0x336   :  { %534 = vst [vmem:[#allocation10 + $0x20] sm:$0xff] %v521_v60 }
 0x33b   :  { %v522_v61 = vpop.f32.mrf.mxu0 }
 0x33c   :  { %v523_v62 = vadd.f32 %v742_v50, %v522_v61 }
 0x33e   :  { %535 = vst [vmem:[#allocation10 + $0x28] sm:$0xff] %v523_v62 }
 0x343   :  { %v525_v63 = vpop.f32.mrf.mxu0 }
 0x344   :  { %v526_v0 = vadd.f32 %v742_v50, %v525_v63 }
 0x346   :  { %536 = vst [vmem:[#allocation10 + $0x30] sm:$0xff] %v526_v0 }
 0x34b   :  { %v527_v1 = vpop.f32.mrf.mxu0 }
 0x34c   :  { %v528_v2 = vadd.f32 %v742_v50, %v527_v1 }
 0x34e   :  { %537 = vst [vmem:[#allocation10 + $0x38] sm:$0xff] %v528_v2 }
 0x34f   :  { %550 = dma.vmem_to_hbm [thread:$0]  %s543_s3, 1024, %s545_s11, [#allocation4], %s878_s12, %s878_s12, %s879_s13  }
 0x350   :  { %869 = dma.done.wait [#allocation4], 1024  }
 0x351   :  { %870 = vsyncadd [#allocation4], 4294966272 }
 0x352   :  { %555 = vsyncpa [#allocation3], 1 }
 0x353   :  { %556 = vsyncpa [#allocation6], 1 }
 0x354   :  { %557 = vsyncpa [#allocation9], 1 }
 0x355   :  { %558 = vsyncpa [#allocation4], 1 }

</bundles_post_ra>
